<compile_context>
chip_gen: v7x
topology: tpu7x:2x2x1
jax: 0.10.0
libtpu: 0.0.40
codegen_flags: <defaults>
</compile_context>

<pallas_src>
import functools

import jax
import jax.numpy as jnp
from jax.experimental import pallas as pl
from jax.experimental.pallas import tpu as pltpu


def _ts_stddev_kernel(x_ref, sel_ref, o_ref, *, d):
    # x_ref: (bn, T) rows of series, T on lanes.  sel_ref: (T, w) 0/1 selector.
    x = x_ref[...].astype(jnp.float32)                    # cast on-chip only
    sel = sel_ref[...]                                    # (T, w) f32, VMEM resident

    # Shifted one-pass variance: subtract a per-row mean so the
    # sumsq - sums^2/d reduction keeps two-pass-level accuracy.
    mu = jnp.mean(x, axis=-1, keepdims=True)              # (bn, 1)  XLU reduce
    y = x - mu                                            # VPU

    sums = jnp.dot(y, sel, preferred_element_type=jnp.float32)        # (bn, w) MXU
    sumsq = jnp.dot(y * y, sel, preferred_element_type=jnp.float32)   # (bn, w) MXU

    inv_d = jnp.float32(1.0 / d)
    inv_dm1 = jnp.float32(1.0 / (d - 1)) if d > 1 else jnp.float32(float("nan"))
    var = (sumsq - sums * sums * inv_d) * inv_dm1
    o_ref[...] = jnp.sqrt(jnp.maximum(var, 0.0))


def _pick_block_rows(rows, T, itemsize, vmem_budget=12 << 20, max_block=1024):
    """Largest row tile (multiple of 8) whose double-buffered input fits budget."""
    cap = max(8, (vmem_budget // (2 * T * itemsize)) // 8 * 8)
    bn = min(max_block, cap)
    if rows <= bn:
        if rows >= 16:
            # Split into >=2 tiles so both v7x TensorCores get work.
            bn = (((rows + 1) // 2) + 7) // 8 * 8
        else:
            bn = rows            # single full-extent block (allowed even if not %8)
    return bn


def ts_stddev(X, d=10, stride=10):
    """Pallas implementation of the ts_stddev module forward pass."""
    B, n, T = X.shape
    w = (T - d) // stride + 1
    assert w >= 1, "need T >= d"

    rows = B * n
    x2d = X.reshape(rows, T)      # contiguous merge of leading dims: no HBM copy

    # Static 0/1 window-selection matrix (T, w), tiny, stays resident in VMEM.
    t = jnp.arange(T, dtype=jnp.int32)[:, None]
    starts = jnp.arange(w, dtype=jnp.int32)[None, :] * stride
    sel = ((t >= starts) & (t < starts + d)).astype(jnp.float32)

    bn = _pick_block_rows(rows, T, X.dtype.itemsize)
    n_tiles = pl.cdiv(rows, bn)

    kernel = functools.partial(_ts_stddev_kernel, d=d)

    out = pl.pallas_call(
        kernel,
        out_shape=jax.ShapeDtypeStruct((rows, w), jnp.float32),
        grid_spec=pltpu.PrefetchScalarGridSpec(
            num_scalar_prefetch=0,
            grid=(n_tiles,),
            in_specs=[
                pl.BlockSpec((bn, T), lambda i: (i, 0)),     # rows of X, native layout
                pl.BlockSpec((T, w), lambda i: (0, 0)),      # selector, same every step
            ],
            out_specs=pl.BlockSpec((bn, w), lambda i: (i, 0)),
        ),
        compiler_params=pltpu.CompilerParams(
            dimension_semantics=("parallel",)),
    )(x2d, sel)

    return out.reshape(B, n, w)


def _reference(X, d=10, stride=10):
    """Plain-JAX reference for verification."""
    B, n, T = X.shape
    w = (T - d) // stride + 1
    cols = [
        jnp.std(X[:, :, i * stride:i * stride + d].astype(jnp.float32),
                axis=-1, ddof=1)
        for i in range(w)
    ]
    return jnp.stack(cols, axis=-1)


if __name__ == "__main__":
    key = jax.random.PRNGKey(0)
    batch, n, T = 2, 200, 40        # d=10, stride=10 -> w = 4; n exercises ragged tiling
    X = jax.random.normal(key, (batch, n, T), dtype=jnp.float32)

    out = jax.block_until_ready(ts_stddev(X, d=10, stride=10))

    ref = _reference(X, d=10, stride=10)
    assert out.shape == (batch, n, 4), out.shape
    assert jnp.allclose(out, ref, atol=1e-5, rtol=1e-5), "mismatch vs reference"

    print("KERNEL_OK")
</pallas_src>

<mosaic_0001>
module attributes {stable_mosaic.version = 11 : i64} {
  func.func @_ts_stddev_kernel(%arg0: i32, %arg1: memref<200x40xf32, #tpu.memory_space<vmem>>, %arg2: memref<40x4xf32, #tpu.memory_space<vmem>>, %arg3: memref<200x4xf32, #tpu.memory_space<vmem>>) attributes {dimension_semantics = [#tpu.dimension_semantics<parallel>], iteration_bounds = array<i64: 2>, scalar_prefetch = 0 : i64, scratch_operands = 0 : i64, tpu.core_type = #tpu.core_type<tc>, window_params = [{transform_indices = @transform_0, window_bounds = array<i64: 200, 40>}, {pipeline_mode = #tpu.pipeline_mode<synchronous>, transform_indices = @transform_1, window_bounds = array<i64: 40, 4>}, {transform_indices = @transform_2, window_bounds = array<i64: 200, 4>}]} {
    %c0 = arith.constant 0 : index
    %c0_0 = arith.constant 0 : index
    %0 = vector.load %arg1[%c0, %c0_0] : memref<200x40xf32, #tpu.memory_space<vmem>>, vector<200x40xf32>
    %c0_1 = arith.constant 0 : index
    %c0_2 = arith.constant 0 : index
    %1 = vector.load %arg2[%c0_1, %c0_2] : memref<40x4xf32, #tpu.memory_space<vmem>>, vector<40x4xf32>
    %cst = arith.constant dense<0.000000e+00> : vector<200xf32>
    %2 = vector.multi_reduction <add>, %0, %cst [1] : vector<200x40xf32> to vector<200xf32>
    %3 = vector.shape_cast %2 : vector<200xf32> to vector<200x1xf32>
    %cst_3 = arith.constant 4.000000e+01 : f32
    %4 = vector.broadcast %cst_3 : f32 to vector<200x1xf32>
    %5 = arith.divf %3, %4 : vector<200x1xf32>
    %6 = vector.broadcast %5 : vector<200x1xf32> to vector<200x40xf32>
    %7 = arith.subf %0, %6 : vector<200x40xf32>
    %cst_4 = arith.constant dense<0.000000e+00> : vector<200x4xf32>
    %8 = tpu.matmul %7, %1, %cst_4 {dimension_numbers = #tpu.dot_dimension_numbers<[1], [0], [0], [1], [0, 0, 1, 1], [], []>} : vector<200x40xf32>, vector<40x4xf32>, vector<200x4xf32> -> vector<200x4xf32>
    %9 = arith.mulf %7, %7 : vector<200x40xf32>
    %cst_5 = arith.constant dense<0.000000e+00> : vector<200x4xf32>
    %10 = tpu.matmul %9, %1, %cst_5 {dimension_numbers = #tpu.dot_dimension_numbers<[1], [0], [0], [1], [0, 0, 1, 1], [], []>} : vector<200x40xf32>, vector<40x4xf32>, vector<200x4xf32> -> vector<200x4xf32>
    %11 = arith.mulf %8, %8 : vector<200x4xf32>
    %cst_6 = arith.constant 1.000000e-01 : f32
    %12 = vector.broadcast %cst_6 : f32 to vector<200x4xf32>
    %13 = arith.mulf %11, %12 : vector<200x4xf32>
    %14 = arith.subf %10, %13 : vector<200x4xf32>
    %cst_7 = arith.constant 0.111111112 : f32
    %15 = vector.broadcast %cst_7 : f32 to vector<200x4xf32>
    %16 = arith.mulf %14, %15 : vector<200x4xf32>
    %cst_8 = arith.constant 0.000000e+00 : f32
    %17 = vector.broadcast %cst_8 : f32 to vector<200x4xf32>
    %18 = arith.maximumf %16, %17 : vector<200x4xf32>
    %19 = math.sqrt %18 : vector<200x4xf32>
    %c0_9 = arith.constant 0 : index
    %c0_10 = arith.constant 0 : index
    %20 = vector.load %arg3[%c0_9, %c0_10] : memref<200x4xf32, #tpu.memory_space<vmem>>, vector<200x4xf32>
    tpu.vector_store %arg3[%c0_9, %c0_10], %19 {strides = array<i32>} : memref<200x4xf32, #tpu.memory_space<vmem>>, vector<200x4xf32>,
    return
  }
  func.func @transform_0(%arg0: i32) -> (i32, i32) {
    %c0_i32 = arith.constant 0 : i32
    %c0_i32_0 = arith.constant 0 : i32
    return %arg0, %c0_i32 : i32, i32
  }
  func.func @transform_1(%arg0: i32) -> (i32, i32) {
    %c0_i32 = arith.constant 0 : i32
    %c0_i32_0 = arith.constant 0 : i32
    %c0_i32_1 = arith.constant 0 : i32
    return %c0_i32, %c0_i32_0 : i32, i32
  }
  func.func @transform_2(%arg0: i32) -> (i32, i32) {
    %c0_i32 = arith.constant 0 : i32
    %c0_i32_0 = arith.constant 0 : i32
    return %arg0, %c0_i32 : i32, i32
  }
}

</mosaic_0001>

<bundles_post_ra>
// kernel: tpu_custom_call.1
= control target key start
LH: loop header
LB: loop body
LE: loop exit
PB: predicated region body
PF: predicated region fallthrough
CT: control target
= control target key end

     0   :  { %s1629_s9 = smov 0   ;;  %s2176_s0 = inlined_call_operand.vmem [shape: f32[400,40], index: 0, kind: input, shape index: {}]   ;;  %s2177_s1 = inlined_call_operand.vmem [shape: f32[40,4], index: 1, kind: input, shape index: {}]   ;;  %s2178_s2 = inlined_call_operand.vmem [shape: f32[400,4], index: 2, kind: output, shape index: {}]  }
   0x1 LB: > { %s1241_s10 = sadd.s32 4294967295, %s1609_s9   ;;  %p1245_p0 = scmp.ge.s32.totalorder %s1609_s9, 1  ;;  %s1609_s9 = sphi %s1629_s9, %s12_s9  }
   0x2   : > { %p113_p1 = scmp.lt.s32.totalorder %s1609_s9, 3 }
   0x4   : > { %p114_p2 = pnand %p1245_p0, %p113_p1 }
   0x5   : > { %s135_s11 = smul.u32 (!%p114_p2), 25, %s1241_s10  ;;  %v172_v0 = vld [vmem:[%s2177_s1] sm:$0xff] (!%p114_p2)  ;;  %v173_v1 = vld [vmem:[%s2177_s1 + $0x8] sm:$0xff] (!%p114_p2)  ;;  %v174_v2 = vld [vmem:[%s2177_s1 + $0x10] sm:$0xff] (!%p114_p2)  ;;  %v1611_v3 = vmov (!%p114_p2), 0.0|0.0   ;;  %vm177_vm0 = vcmask (!%p114_p2), 326656  }
   0x6   : > { %117 = sbr.rel (%p114_p2) target bundleno = 498 (0x1f2), region = 28  ;;  %1530 = vmatprep.subr.bf16.mxu0 (!%p114_p2), %v1611_v3  ;;  %v1531_v4 = vpack.c.bf16 (!%p114_p2), %v173_v1, %v172_v0  ;;  %1536 = vmatprep.subr.bf16.mxu1 (!%p114_p2), %v1611_v3  ;;  %v175_v5 = vld [vmem:[%s2177_s1 + $0x18] sm:$0xff] (!%p114_p2)  ;;  %v176_v29 = vld [vmem:[%s2177_s1 + $0x20] sm:$0xff] (!%p114_p2)  ;;  %v1612_v32 = vmov (!%p114_p2), 0.0   ;;  %vm1613_vm1 = vmmov (!%p114_p2), 0   ;;  %vm1159_vm3 = vcmask (!%p114_p2), 31744  }
   0x7   : > { %p136_p3 = scmp.lt.s32.totalorder (!%p114_p2), %s135_s11, 49  ;;  %v1534_v6 = vpack.c.bf16 (!%p114_p2), %v175_v5, %v174_v2  ;;  %1370 = vmatprep.mubr.msk.f32.mxu0 (!%p114_p2), %vm1613_vm1, %v1612_v32  ;;  %1455 = vmatprep.mubr.msk.f32.mxu1 (!%p114_p2), %vm1613_vm1, %v1612_v32 }
   0x8   : > { %1532 = vmatpush3.bf16.msra.mxu0 (!%p114_p2), %v1531_v4  ;;  %1538 = vmatpush3.bf16.msra.mxu1 (!%p114_p2), %v1531_v4 }
   0x9   : > { %1533 = vmatprep.subr.bf16.mxu0 (!%p114_p2), %v1611_v3  ;;  %1539 = vmatprep.subr.bf16.mxu1 (!%p114_p2), %v1611_v3 }
   0xc   : > { %1535 = vmatpush3.bf16.msra.mxu0 (!%p114_p2), %v1534_v6  ;;  %1541 = vmatpush3.bf16.msra.mxu1 (!%p114_p2), %v1534_v6 }
   0xd   : > { %s2180_s11 = smov (!%p136_p3, %s135_s11), 49  ;;  %1368 = vmatprep.subr.mxu0 %v1612_v32  ;;  %1453 = vmatprep.subr.mxu1 %v1612_v32 }
   0xe   : > { %s1246_s20 = sshll.u32 %s2180_s11, 3 }
   0xf   : > { %s1657_s23 = scalar_lea.vmem %s2176_s0, %s1246_s20  ;;  %s1974_s28 = scalar_lea.vmem %s2178_s2, %s1246_s20 }
  0x10   : > { %v1660_v7 = vld [vmem:[%s1657_s23] sm:$0xff]  ;;  %v1663_v8 = vld [vmem:[%s1657_s23 + $0x8] sm:$0xff]  ;;  %v1666_v9 = vld [vmem:[%s1657_s23 + $0x10] sm:$0xff]  ;;  %1369 = vmatpush3.msra.mxu0 %v176_v29  ;;  %1454 = vmatpush3.msra.mxu1 %v176_v29 }
  0x11   : > { %v178_v10 = vsel %vm177_vm0, %v1660_v7, 0.0  ;;  %v184_v11 = vsel %vm177_vm0, %v1666_v9, 0.0  ;;  %v1673_v12 = vld [vmem:[%s1657_s23 + $0x18] sm:$0xff]  ;;  %v181_v13 = vsel %vm177_vm0, %v1663_v8, 0.0  ;;  %v1680_v15 = vld [vmem:[%s1657_s23 + $0x20] sm:$0xff]  ;;  %v1683_v16 = vld [vmem:[%s1657_s23 + $0x28] sm:$0xff] }
  0x12   : > { %179 = vadd.xlane.f32.xlu0 %v178_v10  ;;  %185 = vadd.xlane.f32.xlu1 %v184_v11  ;;  %v187_v14 = vsel %vm177_vm0, %v1673_v12, 0.0  ;;  %v190_v17 = vsel %vm177_vm0, %v1680_v15, 0.0  ;;  %v193_v18 = vsel %vm177_vm0, %v1683_v16, 0.0  ;;  %v1690_v19 = vld [vmem:[%s1657_s23 + $0x30] sm:$0xff]  ;;  %v1693_v20 = vld [vmem:[%s1657_s23 + $0x38] sm:$0xff]  ;;  %v1700_v23 = vld [vmem:[%s1657_s23 + $0x40] sm:$0xff] }
  0x13   : > { %v196_v21 = vsel %vm177_vm0, %v1690_v19, 0.0  ;;  %v199_v22 = vsel %vm177_vm0, %v1693_v20, 0.0  ;;  %v1703_v24 = vld [vmem:[%s1657_s23 + $0x48] sm:$0xff]  ;;  %v202_v25 = vsel %vm177_vm0, %v1700_v23, 0.0  ;;  %v1710_v27 = vld [vmem:[%s1657_s23 + $0x50] sm:$0xff]  ;;  %v1713_v28 = vld [vmem:[%s1657_s23 + $0x58] sm:$0xff] }
  0x14   : > { %v205_v26 = vsel %vm177_vm0, %v1703_v24, 0.0  ;;  %v208_v30 = vsel %vm177_vm0, %v1710_v27, 0.0  ;;  %v211_v31 = vsel %vm177_vm0, %v1713_v28, 0.0  ;;  %v1726_v33 = vld [vmem:[%s1657_s23 + $0x60] sm:$0xff]  ;;  %v1729_v34 = vld [vmem:[%s1657_s23 + $0x68] sm:$0xff]  ;;  %v1739_v37 = vld [vmem:[%s1657_s23 + $0x70] sm:$0xff] }
  0x15   : > { %v214_v35 = vsel %vm177_vm0, %v1726_v33, 0.0  ;;  %v217_v36 = vsel %vm177_vm0, %v1729_v34, 0.0  ;;  %v1742_v38 = vld [vmem:[%s1657_s23 + $0x78] sm:$0xff]  ;;  %v220_v39 = vsel %vm177_vm0, %v1739_v37, 0.0  ;;  %v1749_v41 = vld [vmem:[%s1657_s23 + $0x80] sm:$0xff]  ;;  %v1752_v42 = vld [vmem:[%s1657_s23 + $0x88] sm:$0xff] }
  0x16   : > { %182 = vadd.xlane.f32.xlu0 %v181_v13  ;;  %188 = vadd.xlane.f32.xlu1 %v187_v14  ;;  %v223_v40 = vsel %vm177_vm0, %v1742_v38, 0.0  ;;  %v226_v43 = vsel %vm177_vm0, %v1749_v41, 0.0  ;;  %v229_v44 = vsel %vm177_vm0, %v1752_v42, 0.0  ;;  %v1759_v45 = vld [vmem:[%s1657_s23 + $0x90] sm:$0xff]  ;;  %v1762_v46 = vld [vmem:[%s1657_s23 + $0x98] sm:$0xff]  ;;  %v1769_v49 = vld [vmem:[%s1657_s23 + $0xa0] sm:$0xff] }
  0x17   : > { %v232_v47 = vsel %vm177_vm0, %v1759_v45, 0.0  ;;  %v235_v48 = vsel %vm177_vm0, %v1762_v46, 0.0  ;;  %v1772_v50 = vld [vmem:[%s1657_s23 + $0xa8] sm:$0xff]  ;;  %v238_v51 = vsel %vm177_vm0, %v1769_v49, 0.0  ;;  %v1779_v53 = vld [vmem:[%s1657_s23 + $0xb0] sm:$0xff]  ;;  %v1782_v54 = vld [vmem:[%s1657_s23 + $0xb8] sm:$0xff] }
  0x18   : > { %v241_v52 = vsel %vm177_vm0, %v1772_v50, 0.0  ;;  %v244_v55 = vsel %vm177_vm0, %v1779_v53, 0.0  ;;  %v247_v56 = vsel %vm177_vm0, %v1782_v54, 0.0  ;;  %v1789_v57 = vld [vmem:[%s1657_s23 + $0xc0] sm:$0xff] }
  0x19   : > { %v250_v58 = vsel %vm177_vm0, %v1789_v57, 0.0 }
  0x1a   : > { %191 = vadd.xlane.f32.xlu0 %v190_v17  ;;  %194 = vadd.xlane.f32.xlu1 %v193_v18 }
  0x1e   : > { %197 = vadd.xlane.f32.xlu0 %v196_v21  ;;  %200 = vadd.xlane.f32.xlu1 %v199_v22 }
  0x22   : > { %203 = vadd.xlane.f32.xlu0 %v202_v25  ;;  %206 = vadd.xlane.f32.xlu1 %v205_v26 }
  0x26   : > { %209 = vadd.xlane.f32.xlu0 %v208_v30  ;;  %212 = vadd.xlane.f32.xlu1 %v211_v31 }
  0x2a   : > { %215 = vadd.xlane.f32.xlu0 %v214_v35  ;;  %218 = vadd.xlane.f32.xlu1 %v217_v36 }
  0x2e   : > { %221 = vadd.xlane.f32.xlu0 %v220_v39  ;;  %224 = vadd.xlane.f32.xlu1 %v223_v40 }
  0x32   : > { %227 = vadd.xlane.f32.xlu0 %v226_v43  ;;  %230 = vadd.xlane.f32.xlu1 %v229_v44 }
  0x36   : > { %233 = vadd.xlane.f32.xlu0 %v232_v47  ;;  %236 = vadd.xlane.f32.xlu1 %v235_v48 }
  0x3a   : > { %239 = vadd.xlane.f32.xlu0 %v238_v51  ;;  %242 = vadd.xlane.f32.xlu1 %v241_v52 }
  0x3e   : > { %245 = vadd.xlane.f32.xlu0 %v244_v55  ;;  %248 = vadd.xlane.f32.xlu1 %v247_v56 }
  0x42   : > { %251 = vadd.xlane.f32.xlu0 %v250_v58 }
  0x9f   : > { %v180_v59 = vpop.xlane.xlu0 %179  ;;  %v186_v60 = vpop.xlane.xlu1 %185 }
  0xa0   : > { %v254_v61 = vmul.f32 0.025, %v180_v59  ;;  %v256_v63 = vmul.f32 0.025, %v186_v60 }
  0xa2   : > { %v279_v62 = vsub.f32 %v1660_v7, %v254_v61  ;;  %v281_v5 = vsub.f32 %v1666_v9, %v256_v63 }
  0xa3   : > { %v183_v0 = vpop.xlane.xlu0 %182  ;;  %v189_v1 = vpop.xlane.xlu1 %188 }
  0xa4   : > { %v569_v2 = vmul.f32 %v279_v62, %v279_v62  ;;  %v255_v3 = vmul.f32 0.025, %v183_v0  ;;  %1371 = vmatmul.mubr.msk.f32.vlgmr.msra.gmra.mrb[0].mxu0 %vm177_vm0, %v279_v62  ;;  %v257_v6 = vmul.f32 0.025, %v189_v1  ;;  %v571_v11 = vmul.f32 %v281_v5, %v281_v5 }
  0xa5   : > { %1373 = vmatprep.mubr.msk.f32.mxu0 %vm1613_vm1, %v1612_v32 }
  0xa6   : > { %v280_v4 = vsub.f32 %v1663_v8, %v255_v3  ;;  %1456 = vmatmul.mubr.msk.f32.vlgmr.msra.gmra.mrb[0].mxu1 %vm177_vm0, %v569_v2  ;;  %v282_v8 = vsub.f32 %v1673_v12, %v257_v6 }
  0xa7   : > { %1458 = vmatprep.mubr.msk.f32.mxu1 %vm1613_vm1, %v1612_v32  ;;  %v192_v7 = vpop.xlane.xlu0 %191  ;;  %v195_v9 = vpop.xlane.xlu1 %194 }
  0xa8   : > { %v570_v10 = vmul.f32 %v280_v4, %v280_v4  ;;  %1374 = vmatmul.mubr.msk.f32.gmra.mrb[2].mxu0 %vm177_vm0, %v280_v4  ;;  %v258_v13 = vmul.f32 0.025, %v192_v7  ;;  %v572_v14 = vmul.f32 %v282_v8, %v282_v8  ;;  %v259_v18 = vmul.f32 0.025, %v195_v9 }
  0xa9   : > { %1376 = vmatprep.mubr.msk.f32.mxu0 %vm1613_vm1, %v1612_v32 }
  0xaa   : > { %1459 = vmatmul.mubr.msk.f32.gmra.mrb[2].mxu1 %vm177_vm0, %v570_v10  ;;  %v283_v17 = vsub.f32 %v1680_v15, %v258_v13  ;;  %v284_v22 = vsub.f32 %v1683_v16, %v259_v18 }
  0xab   : > { %1461 = vmatprep.mubr.msk.f32.mxu1 %vm1613_vm1, %v1612_v32  ;;  %v198_v12 = vpop.xlane.xlu0 %197  ;;  %v201_v15 = vpop.xlane.xlu1 %200 }
  0xac   : > { %1377 = vmatmul.mubr.msk.f32.gmra.mrb[4].mxu0 %vm177_vm0, %v281_v5  ;;  %v573_v21 = vmul.f32 %v283_v17, %v283_v17  ;;  %v260_v25 = vmul.f32 0.025, %v198_v12  ;;  %v574_v26 = vmul.f32 %v284_v22, %v284_v22  ;;  %v261_v30 = vmul.f32 0.025, %v201_v15 }
  0xad   : > { %1379 = vmatprep.mubr.msk.f32.mxu0 %vm1613_vm1, %v1612_v32 }
  0xae   : > { %1462 = vmatmul.mubr.msk.f32.gmra.mrb[4].mxu1 %vm177_vm0, %v571_v11  ;;  %v285_v29 = vsub.f32 %v1690_v19, %v260_v25  ;;  %v286_v35 = vsub.f32 %v1693_v20, %v261_v30 }
  0xaf   : > { %1464 = vmatprep.mubr.msk.f32.mxu1 %vm1613_vm1, %v1612_v32  ;;  %v204_v16 = vpop.xlane.xlu0 %203  ;;  %v207_v19 = vpop.xlane.xlu1 %206 }
  0xb0   : > { %1380 = vmatmul.mubr.msk.f32.gmra.mrb[6].mxu0 %vm177_vm0, %v282_v8  ;;  %v575_v31 = vmul.f32 %v285_v29, %v285_v29  ;;  %v262_v36 = vmul.f32 0.025, %v204_v16  ;;  %v576_v39 = vmul.f32 %v286_v35, %v286_v35  ;;  %v263_v43 = vmul.f32 0.025, %v207_v19 }
  0xb1   : > { %1382 = vmatprep.mubr.msk.f32.mxu0 %vm1613_vm1, %v1612_v32 }
  0xb2   : > { %1465 = vmatmul.mubr.msk.f32.gmra.mrb[6].mxu1 %vm177_vm0, %v572_v14  ;;  %v287_v40 = vsub.f32 %v1700_v23, %v262_v36  ;;  %v288_v47 = vsub.f32 %v1703_v24, %v263_v43 }
  0xb3   : > { %1467 = vmatprep.mubr.msk.f32.mxu1 %vm1613_vm1, %v1612_v32  ;;  %v210_v20 = vpop.xlane.xlu0 %209  ;;  %v213_v23 = vpop.xlane.xlu1 %212 }
  0xb4   : > { %1383 = vmatmul.mubr.msk.f32.gmra.mrb[8].mxu0 %vm177_vm0, %v283_v17  ;;  %v577_v44 = vmul.f32 %v287_v40, %v287_v40  ;;  %v264_v48 = vmul.f32 0.025, %v210_v20  ;;  %v578_v51 = vmul.f32 %v288_v47, %v288_v47  ;;  %v265_v55 = vmul.f32 0.025, %v213_v23 }
  0xb5   : > { %1385 = vmatprep.mubr.msk.f32.mxu0 %vm1613_vm1, %v1612_v32 }
  0xb6   : > { %1468 = vmatmul.mubr.msk.f32.gmra.mrb[8].mxu1 %vm177_vm0, %v573_v21  ;;  %v289_v52 = vsub.f32 %v1710_v27, %v264_v48  ;;  %v290_v58 = vsub.f32 %v1713_v28, %v265_v55 }
  0xb7   : > { %1470 = vmatprep.mubr.msk.f32.mxu1 %vm1613_vm1, %v1612_v32  ;;  %v216_v24 = vpop.xlane.xlu0 %215  ;;  %v219_v27 = vpop.xlane.xlu1 %218 }
  0xb8   : > { %1386 = vmatmul.mubr.msk.f32.gmra.mrb[10].mxu0 %vm177_vm0, %v284_v22  ;;  %v579_v56 = vmul.f32 %v289_v52, %v289_v52  ;;  %v266_v59 = vmul.f32 0.025, %v216_v24  ;;  %v580_v60 = vmul.f32 %v290_v58, %v290_v58  ;;  %v267_v62 = vmul.f32 0.025, %v219_v27 }
  0xb9   : > { %1388 = vmatprep.mubr.msk.f32.mxu0 %vm1613_vm1, %v1612_v32 }
  0xba   : > { %1471 = vmatmul.mubr.msk.f32.gmra.mrb[10].mxu1 %vm177_vm0, %v574_v26  ;;  %v291_v61 = vsub.f32 %v1726_v33, %v266_v59  ;;  %v292_v0 = vsub.f32 %v1729_v34, %v267_v62 }
  0xbb   : > { %1473 = vmatprep.mubr.msk.f32.mxu1 %vm1613_vm1, %v1612_v32  ;;  %v222_v28 = vpop.xlane.xlu0 %221  ;;  %v225_v33 = vpop.xlane.xlu1 %224 }
  0xbc   : > { %1389 = vmatmul.mubr.msk.f32.gmra.mrb[12].mxu0 %vm177_vm0, %v285_v29  ;;  %v581_v63 = vmul.f32 %v291_v61, %v291_v61  ;;  %v268_v1 = vmul.f32 0.025, %v222_v28  ;;  %v582_v2 = vmul.f32 %v292_v0, %v292_v0  ;;  %v269_v4 = vmul.f32 0.025, %v225_v33 }
  0xbd   : > { %1391 = vmatprep.mubr.msk.f32.mxu0 %vm1613_vm1, %v1612_v32 }
  0xbe   : > { %1474 = vmatmul.mubr.msk.f32.gmra.mrb[12].mxu1 %vm177_vm0, %v575_v31  ;;  %v293_v3 = vsub.f32 %v1739_v37, %v268_v1  ;;  %v294_v6 = vsub.f32 %v1742_v38, %v269_v4 }
  0xbf   : > { %1476 = vmatprep.mubr.msk.f32.mxu1 %vm1613_vm1, %v1612_v32  ;;  %v228_v34 = vpop.xlane.xlu0 %227  ;;  %v231_v37 = vpop.xlane.xlu1 %230 }
  0xc0   : > { %1392 = vmatmul.mubr.msk.f32.gmra.mrb[14].mxu0 %vm177_vm0, %v286_v35  ;;  %v583_v5 = vmul.f32 %v293_v3, %v293_v3  ;;  %v270_v7 = vmul.f32 0.025, %v228_v34  ;;  %v584_v10 = vmul.f32 %v294_v6, %v294_v6  ;;  %v271_v8 = vmul.f32 0.025, %v231_v37 }
  0xc1   : > { %1394 = vmatprep.mubr.msk.f32.mxu0 %vm1613_vm1, %v1612_v32 }
  0xc2   : > { %1477 = vmatmul.mubr.msk.f32.gmra.mrb[14].mxu1 %vm177_vm0, %v576_v39  ;;  %v295_v11 = vsub.f32 %v1749_v41, %v270_v7  ;;  %v296_v9 = vsub.f32 %v1752_v42, %v271_v8 }
  0xc3   : > { %1479 = vmatprep.mubr.msk.f32.mxu1 %vm1613_vm1, %v1612_v32  ;;  %v234_v38 = vpop.xlane.xlu0 %233  ;;  %v237_v41 = vpop.xlane.xlu1 %236 }
  0xc4   : > { %1395 = vmatmul.mubr.msk.f32.gmra.mrb[16].mxu0 %vm177_vm0, %v287_v40  ;;  %v585_v13 = vmul.f32 %v295_v11, %v295_v11  ;;  %v272_v14 = vmul.f32 0.025, %v234_v38  ;;  %v586_v17 = vmul.f32 %v296_v9, %v296_v9  ;;  %v273_v12 = vmul.f32 0.025, %v237_v41 }
  0xc5   : > { %1397 = vmatprep.mubr.msk.f32.mxu0 %vm1613_vm1, %v1612_v32 }
  0xc6   : > { %1480 = vmatmul.mubr.msk.f32.gmra.mrb[16].mxu1 %vm177_vm0, %v577_v44  ;;  %v297_v18 = vsub.f32 %v1759_v45, %v272_v14  ;;  %v298_v22 = vsub.f32 %v1762_v46, %v273_v12 }
  0xc7   : > { %1482 = vmatprep.mubr.msk.f32.mxu1 %vm1613_vm1, %v1612_v32  ;;  %v240_v42 = vpop.xlane.xlu0 %239  ;;  %v243_v45 = vpop.xlane.xlu1 %242 }
  0xc8   : > { %1398 = vmatmul.mubr.msk.f32.gmra.mrb[18].mxu0 %vm177_vm0, %v288_v47  ;;  %v587_v21 = vmul.f32 %v297_v18, %v297_v18  ;;  %v274_v25 = vmul.f32 0.025, %v240_v42  ;;  %v588_v15 = vmul.f32 %v298_v22, %v298_v22  ;;  %v275_v29 = vmul.f32 0.025, %v243_v45 }
  0xc9   : > { %1400 = vmatprep.mubr.msk.f32.mxu0 %vm1613_vm1, %v1612_v32 }
  0xca   : > { %1483 = vmatmul.mubr.msk.f32.gmra.mrb[18].mxu1 %vm177_vm0, %v578_v51  ;;  %v299_v26 = vsub.f32 %v1769_v49, %v274_v25  ;;  %v300_v16 = vsub.f32 %v1772_v50, %v275_v29 }
  0xcb   : > { %1485 = vmatprep.mubr.msk.f32.mxu1 %vm1613_vm1, %v1612_v32  ;;  %v246_v46 = vpop.xlane.xlu0 %245  ;;  %v249_v49 = vpop.xlane.xlu1 %248 }
  0xcc   : > { %1401 = vmatmul.mubr.msk.f32.gmra.mrb[20].mxu0 %vm177_vm0, %v289_v52  ;;  %v589_v30 = vmul.f32 %v299_v26, %v299_v26  ;;  %v276_v31 = vmul.f32 0.025, %v246_v46  ;;  %v590_v35 = vmul.f32 %v300_v16, %v300_v16  ;;  %v277_v19 = vmul.f32 0.025, %v249_v49 }
  0xcd   : > { %1403 = vmatprep.mubr.msk.f32.mxu0 %vm1613_vm1, %v1612_v32 }
  0xce   : > { %1486 = vmatmul.mubr.msk.f32.gmra.mrb[20].mxu1 %vm177_vm0, %v579_v56  ;;  %v301_v36 = vsub.f32 %v1779_v53, %v276_v31  ;;  %v302_v40 = vsub.f32 %v1782_v54, %v277_v19 }
  0xcf   : > { %1488 = vmatprep.mubr.msk.f32.mxu1 %vm1613_vm1, %v1612_v32  ;;  %v252_v50 = vpop.xlane.xlu0 %251 }
  0xd0   : > { %1404 = vmatmul.mubr.msk.f32.gmra.mrb[22].mxu0 %vm177_vm0, %v290_v58  ;;  %v591_v39 = vmul.f32 %v301_v36, %v301_v36  ;;  %v278_v43 = vmul.f32 0.025, %v252_v50  ;;  %v592_v53 = vmul.f32 %v302_v40, %v302_v40 }
  0xd1   : > { %1406 = vmatprep.mubr.msk.f32.mxu0 %vm1613_vm1, %v1612_v32 }
  0xd2   : > { %1489 = vmatmul.mubr.msk.f32.gmra.mrb[22].mxu1 %vm177_vm0, %v580_v60  ;;  %v303_v20 = vsub.f32 %v1789_v57, %v278_v43 }
  0xd3   : > { %1491 = vmatprep.mubr.msk.f32.mxu1 %vm1613_vm1, %v1612_v32 }
  0xd4   : > { %1407 = vmatmul.mubr.msk.f32.gmra.mrb[24].mxu0 %vm177_vm0, %v291_v61  ;;  %v593_v54 = vmul.f32 %v303_v20, %v303_v20 }
  0xd5   : > { %1409 = vmatprep.mubr.msk.f32.mxu0 %vm1613_vm1, %v1612_v32 }
  0xd6   : > { %1492 = vmatmul.mubr.msk.f32.gmra.mrb[24].mxu1 %vm177_vm0, %v581_v63 }
  0xd7   : > { %1494 = vmatprep.mubr.msk.f32.mxu1 %vm1613_vm1, %v1612_v32 }
  0xd8   : > { %1410 = vmatmul.mubr.msk.f32.gmra.mrb[26].mxu0 %vm177_vm0, %v292_v0 }
  0xd9   : > { %1412 = vmatprep.mubr.msk.f32.mxu0 %vm1613_vm1, %v1612_v32 }
  0xda   : > { %1495 = vmatmul.mubr.msk.f32.gmra.mrb[26].mxu1 %vm177_vm0, %v582_v2 }
  0xdb   : > { %1497 = vmatprep.mubr.msk.f32.mxu1 %vm1613_vm1, %v1612_v32 }
  0xdc   : > { %1413 = vmatmul.mubr.msk.f32.gmra.mrb[28].mxu0 %vm177_vm0, %v293_v3 }
  0xdd   : > { %1415 = vmatprep.mubr.msk.f32.mxu0 %vm1613_vm1, %v1612_v32 }
  0xde   : > { %1498 = vmatmul.mubr.msk.f32.gmra.mrb[28].mxu1 %vm177_vm0, %v583_v5 }
  0xdf   : > { %1500 = vmatprep.mubr.msk.f32.mxu1 %vm1613_vm1, %v1612_v32 }
  0xe0   : > { %1416 = vmatmul.mubr.msk.f32.gmra.mrb[30].mxu0 %vm177_vm0, %v294_v6 }
  0xe1   : > { %1418 = vmatprep.mubr.msk.f32.mxu0 %vm1613_vm1, %v1612_v32 }
  0xe2   : > { %1501 = vmatmul.mubr.msk.f32.gmra.mrb[30].mxu1 %vm177_vm0, %v584_v10 }
  0xe3   : > { %1503 = vmatprep.mubr.msk.f32.mxu1 %vm1613_vm1, %v1612_v32 }
  0xe4   : > { %1419 = vmatmul.mubr.msk.f32.gmra.mrb[32].mxu0 %vm177_vm0, %v295_v11 }
  0xe5   : > { %1421 = vmatprep.mubr.msk.f32.mxu0 %vm1613_vm1, %v1612_v32 }
  0xe6   : > { %1504 = vmatmul.mubr.msk.f32.gmra.mrb[32].mxu1 %vm177_vm0, %v585_v13 }
  0xe7   : > { %1506 = vmatprep.mubr.msk.f32.mxu1 %vm1613_vm1, %v1612_v32 }
  0xe8   : > { %1422 = vmatmul.mubr.msk.f32.gmra.mrb[34].mxu0 %vm177_vm0, %v296_v9 }
  0xe9   : > { %1424 = vmatprep.mubr.msk.f32.mxu0 %vm1613_vm1, %v1612_v32 }
  0xea   : > { %1507 = vmatmul.mubr.msk.f32.gmra.mrb[34].mxu1 %vm177_vm0, %v586_v17 }
  0xeb   : > { %1509 = vmatprep.mubr.msk.f32.mxu1 %vm1613_vm1, %v1612_v32 }
  0xec   : > { %1425 = vmatmul.mubr.msk.f32.gmra.mrb[36].mxu0 %vm177_vm0, %v297_v18 }
  0xed   : > { %1427 = vmatprep.mubr.msk.f32.mxu0 %vm1613_vm1, %v1612_v32 }
  0xee   : > { %1510 = vmatmul.mubr.msk.f32.gmra.mrb[36].mxu1 %vm177_vm0, %v587_v21 }
  0xef   : > { %1512 = vmatprep.mubr.msk.f32.mxu1 %vm1613_vm1, %v1612_v32 }
  0xf0   : > { %1428 = vmatmul.mubr.msk.f32.gmra.mrb[38].mxu0 %vm177_vm0, %v298_v22 }
  0xf1   : > { %1430 = vmatprep.mubr.msk.f32.mxu0 %vm1613_vm1, %v1612_v32 }
  0xf2   : > { %1513 = vmatmul.mubr.msk.f32.gmra.mrb[38].mxu1 %vm177_vm0, %v588_v15 }
  0xf3   : > { %1515 = vmatprep.mubr.msk.f32.mxu1 %vm1613_vm1, %v1612_v32 }
  0xf4   : > { %1431 = vmatmul.mubr.msk.f32.gmra.mrb[40].mxu0 %vm177_vm0, %v299_v26 }
  0xf5   : > { %1433 = vmatprep.mubr.msk.f32.mxu0 %vm1613_vm1, %v1612_v32 }
  0xf6   : > { %1516 = vmatmul.mubr.msk.f32.gmra.mrb[40].mxu1 %vm177_vm0, %v589_v30 }
  0xf7   : > { %1518 = vmatprep.mubr.msk.f32.mxu1 %vm1613_vm1, %v1612_v32 }
  0xf8   : > { %1434 = vmatmul.mubr.msk.f32.gmra.mrb[42].mxu0 %vm177_vm0, %v300_v16 }
  0xf9   : > { %1436 = vmatprep.mubr.msk.f32.mxu0 %vm1613_vm1, %v1612_v32 }
  0xfa   : > { %1519 = vmatmul.mubr.msk.f32.gmra.mrb[42].mxu1 %vm177_vm0, %v590_v35 }
  0xfb   : > { %1521 = vmatprep.mubr.msk.f32.mxu1 %vm1613_vm1, %v1612_v32 }
  0xfc   : > { %1437 = vmatmul.mubr.msk.f32.gmra.mrb[44].mxu0 %vm177_vm0, %v301_v36 }
  0xfd   : > { %1439 = vmatprep.mubr.msk.f32.mxu0 %vm1613_vm1, %v1612_v32 }
  0xfe   : > { %1522 = vmatmul.mubr.msk.f32.gmra.mrb[44].mxu1 %vm177_vm0, %v591_v39 }
  0xff   : > { %1524 = vmatprep.mubr.msk.f32.mxu1 %vm1613_vm1, %v1612_v32 }
 0x100   : > { %1440 = vmatmul.mubr.msk.f32.gmra.mrb[46].mxu0 %vm177_vm0, %v302_v40 }
 0x101   : > { %1442 = vmatprep.mubr.msk.f32.mxu0 %vm1613_vm1, %v1612_v32 }
 0x102   : > { %1525 = vmatmul.mubr.msk.f32.gmra.mrb[46].mxu1 %vm177_vm0, %v592_v53 }
 0x103   : > { %1527 = vmatprep.mubr.msk.f32.mxu1 %vm1613_vm1, %v1612_v32 }
 0x104   : > { %1443 = vmatmul.mubr.msk.f32.gmra.mrb[48].mxu0 %vm177_vm0, %v303_v20 }
 0x106   : > { %1528 = vmatmul.mubr.msk.f32.gmra.mrb[48].mxu1 %vm177_vm0, %v593_v54 }
 0x177   : > { %v445_v44 = vpop.f32.mrb[0].mxu0 }
 0x178   : > { %v859_v57 = vmul.f32 %v445_v44, %v445_v44  ;;  %v1372_v47 = vpop.f32.mrb[1].mxu0 }
 0x179   : > { %v735_v48 = vpop.f32.mrb[0].mxu1 }
 0x17a   : > { %v884_v23 = vmul.f32 0.1, %v859_v57  ;;  %v1457_v51 = vpop.f32.mrb[1].mxu1 }
 0x17b   : > { %v450_v52 = vpop.f32.mrb[2].mxu0 }
 0x17c   : > { %v909_v55 = vsub.f32 %v735_v48, %v884_v23  ;;  %v860_v24 = vmul.f32 %v450_v52, %v450_v52  ;;  %v1375_v56 = vpop.f32.mrb[3].mxu0 }
 0x17d   : > { %v740_v58 = vpop.f32.mrb[2].mxu1 }
 0x17e   : > { %v934_v59 = vmul.f32 0.11111111, %v909_v55  ;;  %v885_v27 = vmul.f32 0.1, %v860_v24  ;;  %v1460_v60 = vpop.f32.mrb[3].mxu1 }
 0x17f   : > { %v455_v61 = vpop.f32.mrb[4].mxu0 }
 0x180   : > { %v959_v32 = vmax.f32 %v934_v59, 0.0  ;;  %v910_v62 = vsub.f32 %v740_v58, %v885_v27  ;;  %v861_v28 = vmul.f32 %v455_v61, %v455_v61  ;;  %v1378_v63 = vpop.f32.mrb[5].mxu0 }
 0x181   : > { %v745_v0 = vpop.f32.mrb[4].mxu1 }
 0x182   : > { %1553 = vrsqrt.f32 %v959_v32  ;;  %v1463_v1 = vpop.f32.mrb[5].mxu1  ;;  %v935_v33 = vmul.f32 0.11111111, %v910_v62  ;;  %v886_v2 = vmul.f32 0.1, %v861_v28  ;;  %vm986_vm2 = vcmp.eq.f32.partialorder %v959_v32, inf }
 0x183   : > { %v460_v3 = vpop.f32.mrb[6].mxu0  ;;  %v989_v46 = vand.u32 2147483648, %v959_v32  ;;  %vm988_vm4 = vcmp.eq.f32.partialorder %v959_v32, 0.0 }
 0x184   : > { %v862_v4 = vmul.f32 %v460_v3, %v460_v3  ;;  %v1381_v34 = vpop.f32.mrb[7].mxu0  ;;  %v960_v5 = vmax.f32 %v935_v33, 0.0  ;;  %v911_v6 = vsub.f32 %v745_v0, %v886_v2 }
 0x185   : > { %v750_v7 = vpop.f32.mrb[6].mxu1 }
 0x186   : > { %v887_v37 = vmul.f32 0.1, %v862_v4  ;;  %v1466_v10 = vpop.f32.mrb[7].mxu1  ;;  %1555 = vrsqrt.f32 %v960_v5  ;;  %v936_v8 = vmul.f32 0.11111111, %v911_v6  ;;  %vm993_vm5 = vcmp.eq.f32.partialorder %v960_v5, inf }
 0x187   : > { %v465_v11 = vpop.f32.mrb[8].mxu0  ;;  %v996_v44 = vand.u32 2147483648, %v960_v5  ;;  %vm995_vm6 = vcmp.eq.f32.partialorder %v960_v5, 0.0 }
 0x188   : > { %v912_v38 = vsub.f32 %v750_v7, %v887_v37  ;;  %v863_v13 = vmul.f32 %v465_v11, %v465_v11  ;;  %v1384_v9 = vpop.f32.mrb[9].mxu0  ;;  %v1964_v41 = vmax.f32 %v936_v8, 0.0 }
 0x189   : > { %v755_v14 = vpop.f32.mrb[8].mxu1 }
 0x18a   : > { %v937_v17 = vmul.f32 0.11111111, %v912_v38  ;;  %v888_v18 = vmul.f32 0.1, %v863_v13  ;;  %v1469_v12 = vpop.f32.mrb[9].mxu1  ;;  %1557 = vrsqrt.f32 %v1964_v41  ;;  %vm1000_vm7 = vcmp.eq.f32.partialorder %v1964_v41, inf }
 0x18b   : > { %v470_v42 = vpop.f32.mrb[10].mxu0  ;;  %v1003_v62 = vand.u32 2147483648, %v1964_v41  ;;  %vm1002_vm8 = vcmp.eq.f32.partialorder %v1964_v41, 0.0 }
 0x18c   : > { %v1554_v21 = vpop.eup %1553  ;;  %v1387_v22 = vpop.f32.mrb[11].mxu0  ;;  %v1967_v45 = vmax.f32 %v937_v17, 0.0  ;;  %v913_v15 = vsub.f32 %v755_v14, %v888_v18  ;;  %v864_v26 = vmul.f32 %v470_v42, %v470_v42 }
 0x18d   : > { %v985_v25 = vmul.f32 %v1554_v21, %v959_v32  ;;  %v760_v29 = vpop.f32.mrb[10].mxu1 }
 0x18e   : > { %v1472_v30 = vpop.f32.mrb[11].mxu1  ;;  %1559 = vrsqrt.f32 %v1967_v45  ;;  %v938_v35 = vmul.f32 0.11111111, %v913_v15  ;;  %v889_v36 = vmul.f32 0.1, %v864_v26  ;;  %vm1007_vm9 = vcmp.eq.f32.partialorder %v1967_v45, inf }
 0x18f   : > { %v987_v16 = vsel %vm986_vm2, %v959_v32, %v985_v25  ;;  %v475_v31 = vpop.f32.mrb[12].mxu0  ;;  %v1010_v6 = vand.u32 2147483648, %v1967_v45  ;;  %vm1009_vm10 = vcmp.eq.f32.partialorder %v1967_v45, 0.0 }
 0x190   : > { %v990_v49 = vsel %vm988_vm4, %v989_v46, %v987_v16  ;;  %v1390_v19 = vpop.f32.mrb[13].mxu0  ;;  %v1556_v50 = vpop.eup %1555  ;;  %v865_v39 = vmul.f32 %v475_v31, %v475_v31  ;;  %v1979_v53 = vmax.f32 %v938_v35, 0.0  ;;  %v914_v20 = vsub.f32 %v760_v29, %v889_v36 }
 0x191   : > { %1160 = vst.msk [vmem:[%s1974_s28] sm:$0xff] %vm1159_vm3, %v990_v49  ;;  %v765_v40 = vpop.f32.mrb[12].mxu1  ;;  %v992_v43 = vmul.f32 %v1556_v50, %v960_v5 }
 0x192   : > { %v1475_v54 = vpop.f32.mrb[13].mxu1  ;;  %v890_v57 = vmul.f32 0.1, %v865_v39  ;;  %1561 = vrsqrt.f32 %v1979_v53  ;;  %v939_v52 = vmul.f32 0.11111111, %v914_v20  ;;  %vm1014_vm11 = vcmp.eq.f32.partialorder %v1979_v53, inf }
 0x193   : > { %v480_v47 = vpop.f32.mrb[14].mxu0  ;;  %v994_v48 = vsel %vm993_vm5, %v960_v5, %v992_v43  ;;  %v1017_v25 = vand.u32 2147483648, %v1979_v53  ;;  %vm1016_vm12 = vcmp.eq.f32.partialorder %v1979_v53, 0.0 }
 0x194   : > { %v1393_v23 = vpop.f32.mrb[15].mxu0  ;;  %v997_v51 = vsel %vm995_vm6, %v996_v44, %v994_v48  ;;  %v915_v55 = vsub.f32 %v765_v40, %v890_v57  ;;  %v1558_v56 = vpop.eup %1557  ;;  %v866_v58 = vmul.f32 %v480_v47, %v480_v47  ;;  %v1985_v60 = vmax.f32 %v939_v52, 0.0 }
 0x195   : > { %v770_v24 = vpop.f32.mrb[14].mxu1  ;;  %1161 = vst.msk [vmem:[%s1974_s28 + $0x8] sm:$0xff] %vm1159_vm3, %v997_v51  ;;  %v999_v27 = vmul.f32 %v1558_v56, %v1964_v41 }
 0x196   : > { %v1478_v59 = vpop.f32.mrb[15].mxu1  ;;  %v940_v61 = vmul.f32 0.11111111, %v915_v55  ;;  %v891_v28 = vmul.f32 0.1, %v866_v58  ;;  %1563 = vrsqrt.f32 %v1985_v60  ;;  %vm1021_vm13 = vcmp.eq.f32.partialorder %v1985_v60, inf }
 0x197   : > { %v485_v32 = vpop.f32.mrb[16].mxu0  ;;  %v1001_v33 = vsel %vm1000_vm7, %v1964_v41, %v999_v27  ;;  %v1024_v40 = vand.u32 2147483648, %v1985_v60  ;;  %vm1023_vm14 = vcmp.eq.f32.partialorder %v1985_v60, 0.0 }
 0x198   : > { %v867_v63 = vmul.f32 %v485_v32, %v485_v32  ;;  %v1396_v0 = vpop.f32.mrb[17].mxu0  ;;  %v1560_v1 = vpop.eup %1559  ;;  %v1004_v3 = vsel %vm1002_vm8, %v1003_v62, %v1001_v33  ;;  %v1993_v34 = vmax.f32 %v940_v61, 0.0  ;;  %v916_v7 = vsub.f32 %v770_v24, %v891_v28 }
 0x199   : > { %v775_v2 = vpop.f32.mrb[16].mxu1  ;;  %v1006_v4 = vmul.f32 %v1560_v1, %v1967_v45  ;;  %1162 = vst.msk [vmem:[%s1974_s28 + $0x10] sm:$0xff] %vm1159_vm3, %v1004_v3 }
 0x19a   : > { %v1481_v5 = vpop.f32.mrb[17].mxu1  ;;  %v892_v37 = vmul.f32 0.1, %v867_v63  ;;  %1565 = vrsqrt.f32 %v1993_v34  ;;  %v941_v13 = vmul.f32 0.11111111, %v916_v7  ;;  %vm1028_vm15 = vcmp.eq.f32.partialorder %v1993_v34, inf }
 0x19b   : > { %v490_v10 = vpop.f32.mrb[18].mxu0  ;;  %v1008_v11 = vsel %vm1007_vm9, %v1967_v45, %v1006_v4  ;;  %v1031_v24 = vand.u32 2147483648, %v1993_v34  ;;  %vm1030_vm0 = vcmp.eq.f32.partialorder %v1993_v34, 0.0 }
 0x19c   : > { %v1399_v8 = vpop.f32.mrb[19].mxu0  ;;  %v1011_v38 = vsel %vm1009_vm10, %v1010_v6, %v1008_v11  ;;  %v917_v9 = vsub.f32 %v775_v2, %v892_v37  ;;  %v1562_v41 = vpop.eup %1561  ;;  %v868_v17 = vmul.f32 %v490_v10, %v490_v10  ;;  %v2005_v42 = vmax.f32 %v941_v13, 0.0 }
 0x19d   : > { %v780_v14 = vpop.f32.mrb[18].mxu1  ;;  %1163 = vst.msk [vmem:[%s1974_s28 + $0x18] sm:$0xff] %vm1159_vm3, %v1011_v38  ;;  %v1013_v12 = vmul.f32 %v1562_v41, %v1979_v53 }
 0x19e   : > { %v1484_v18 = vpop.f32.mrb[19].mxu1  ;;  %v942_v21 = vmul.f32 0.11111111, %v917_v9  ;;  %v893_v45 = vmul.f32 0.1, %v868_v17  ;;  %1567 = vrsqrt.f32 %v2005_v42  ;;  %vm1035_vm1 = vcmp.eq.f32.partialorder %v2005_v42, inf }
 0x19f   : > { %v495_v22 = vpop.f32.mrb[20].mxu0  ;;  %v1015_v29 = vsel %vm1014_vm11, %v1979_v53, %v1013_v12  ;;  %v1038_v3 = vand.u32 2147483648, %v2005_v42  ;;  %vm1037_vm2 = vcmp.eq.f32.partialorder %v2005_v42, 0.0 }
 0x1a0   : > { %v869_v15 = vmul.f32 %v495_v22, %v495_v22  ;;  %v1402_v26 = vpop.f32.mrb[21].mxu0  ;;  %v1018_v30 = vsel %vm1016_vm12, %v1017_v25, %v1015_v29  ;;  %v2012_v16 = vmax.f32 %v942_v21, 0.0  ;;  %v918_v31 = vsub.f32 %v780_v14, %v893_v45  ;;  %v1564_v35 = vpop.eup %1563 }
 0x1a1   : > { %v785_v46 = vpop.f32.mrb[20].mxu1  ;;  %1164 = vst.msk [vmem:[%s1974_s28 + $0x20] sm:$0xff] %vm1159_vm3, %v1018_v30  ;;  %v1020_v50 = vmul.f32 %v1564_v35, %v1985_v60 }
 0x1a2   : > { %v1487_v49 = vpop.f32.mrb[21].mxu1  ;;  %v894_v36 = vmul.f32 0.1, %v869_v15  ;;  %1569 = vrsqrt.f32 %v2012_v16  ;;  %v943_v43 = vmul.f32 0.11111111, %v918_v31  ;;  %vm1042_vm4 = vcmp.eq.f32.partialorder %v2012_v16, inf }
 0x1a3   : > { %v500_v19 = vpop.f32.mrb[22].mxu0  ;;  %v1022_v57 = vsel %vm1021_vm13, %v1985_v60, %v1020_v50  ;;  %v1045_v14 = vand.u32 2147483648, %v2012_v16  ;;  %vm1044_vm5 = vcmp.eq.f32.partialorder %v2012_v16, 0.0 }
 0x1a4   : > { %v1405_v39 = vpop.f32.mrb[23].mxu0  ;;  %v919_v53 = vsub.f32 %v785_v46, %v894_v36  ;;  %v870_v20 = vmul.f32 %v500_v19, %v500_v19  ;;  %v1566_v44 = vpop.eup %1565  ;;  %v1025_v48 = vsel %vm1023_vm14, %v1024_v40, %v1022_v57  ;;  %v2023_v51 = vmax.f32 %v943_v43, 0.0 }
 0x1a5   : > { %v790_v54 = vpop.f32.mrb[22].mxu1  ;;  %v1027_v23 = vmul.f32 %v1566_v44, %v1993_v34  ;;  %1165 = vst.msk [vmem:[%s1974_s28 + $0x28] sm:$0xff] %vm1159_vm3, %v1025_v48 }
 0x1a6   : > { %v1490_v47 = vpop.f32.mrb[23].mxu1  ;;  %v944_v52 = vmul.f32 0.11111111, %v919_v53  ;;  %v895_v56 = vmul.f32 0.1, %v870_v20  ;;  %1571 = vrsqrt.f32 %v2023_v51  ;;  %vm1049_vm6 = vcmp.eq.f32.partialorder %v2023_v51, inf }
 0x1a7   : > { %v505_v55 = vpop.f32.mrb[24].mxu0  ;;  %v1029_v27 = vsel %vm1028_vm15, %v1993_v34, %v1027_v23  ;;  %vm1051_vm7 = vcmp.eq.f32.partialorder %v2023_v51, 0.0 }
 0x1a8   : > { %v871_v58 = vmul.f32 %v505_v55, %v505_v55  ;;  %v1408_v59 = vpop.f32.mrb[25].mxu0  ;;  %v1032_v61 = vsel %vm1030_vm0, %v1031_v24, %v1029_v27  ;;  %v2032_v32 = vmax.f32 %v944_v52, 0.0  ;;  %v920_v62 = vsub.f32 %v790_v54, %v895_v56  ;;  %v1568_v63 = vpop.eup %1567 }
 0x1a9   : > { %v795_v60 = vpop.f32.mrb[24].mxu1  ;;  %1166 = vst.msk [vmem:[%s1974_s28 + $0x30] sm:$0xff] %vm1159_vm3, %v1032_v61  ;;  %v1034_v33 = vmul.f32 %v1568_v63, %v2005_v42 }
 0x1aa   : > { %v1493_v28 = vpop.f32.mrb[25].mxu1  ;;  %v896_v0 = vmul.f32 0.1, %v871_v58  ;;  %1573 = vrsqrt.f32 %v2032_v32  ;;  %v945_v4 = vmul.f32 0.11111111, %v920_v62  ;;  %vm1056_vm8 = vcmp.eq.f32.partialorder %v2032_v32, inf }
 0x1ab   : > { %v510_v1 = vpop.f32.mrb[26].mxu0  ;;  %v1036_v37 = vsel %vm1035_vm1, %v2005_v42, %v1034_v33  ;;  %v1059_v44 = vand.u32 2147483648, %v2032_v32  ;;  %vm1058_vm9 = vcmp.eq.f32.partialorder %v2032_v32, 0.0 }
 0x1ac   : > { %v1411_v2 = vpop.f32.mrb[27].mxu0  ;;  %v921_v34 = vsub.f32 %v795_v60, %v896_v0  ;;  %v872_v5 = vmul.f32 %v510_v1, %v510_v1  ;;  %v1570_v7 = vpop.eup %1569  ;;  %v1039_v11 = vsel %vm1037_vm2, %v1038_v3, %v1036_v37  ;;  %v2043_v38 = vmax.f32 %v945_v4, 0.0 }
 0x1ad   : > { %v800_v6 = vpop.f32.mrb[26].mxu1  ;;  %v1041_v8 = vmul.f32 %v1570_v7, %v2012_v16  ;;  %1167 = vst.msk [vmem:[%s1974_s28 + $0x38] sm:$0xff] %vm1159_vm3, %v1039_v11 }
 0x1ae   : > { %v1496_v10 = vpop.f32.mrb[27].mxu1  ;;  %v946_v13 = vmul.f32 0.11111111, %v921_v34  ;;  %v897_v41 = vmul.f32 0.1, %v872_v5  ;;  %1575 = vrsqrt.f32 %v2043_v38  ;;  %vm1063_vm10 = vcmp.eq.f32.partialorder %v2043_v38, inf }
 0x1af   : > { %v515_v9 = vpop.f32.mrb[28].mxu0  ;;  %v1043_v12 = vsel %vm1042_vm4, %v2012_v16, %v1041_v8  ;;  %v1052_v16 = vand.u32 2147483648, %v2023_v51  ;;  %vm1065_vm11 = vcmp.eq.f32.partialorder %v2043_v38, 0.0 }
 0x1b0   : > { %v873_v17 = vmul.f32 %v515_v9, %v515_v9  ;;  %v1414_v18 = vpop.f32.mrb[29].mxu0  ;;  %v1046_v21 = vsel %vm1044_vm5, %v1045_v14, %v1043_v12  ;;  %v2052_v22 = vmax.f32 %v946_v13, 0.0  ;;  %v922_v25 = vsub.f32 %v800_v6, %v897_v41  ;;  %v1572_v15 = vpop.eup %1571 }
 0x1b1   : > { %v805_v42 = vpop.f32.mrb[28].mxu1  ;;  %1168 = vst.msk [vmem:[%s1974_s28 + $0x40] sm:$0xff] %vm1159_vm3, %v1046_v21  ;;  %v1048_v46 = vmul.f32 %v1572_v15, %v2023_v51 }
 0x1b2   : > { %v1499_v45 = vpop.f32.mrb[29].mxu1  ;;  %v898_v26 = vmul.f32 0.1, %v873_v17  ;;  %1577 = vrsqrt.f32 %v2052_v22  ;;  %v947_v31 = vmul.f32 0.11111111, %v922_v25  ;;  %vm1070_vm12 = vcmp.eq.f32.partialorder %v2052_v22, inf }
 0x1b3   : > { %v520_v29 = vpop.f32.mrb[30].mxu0  ;;  %v1050_v50 = vsel %vm1049_vm6, %v2023_v51, %v1048_v46  ;;  %v1073_v7 = vand.u32 2147483648, %v2052_v22  ;;  %vm1072_vm13 = vcmp.eq.f32.partialorder %v2052_v22, 0.0 }
 0x1b4   : > { %v1417_v30 = vpop.f32.mrb[31].mxu0  ;;  %v923_v49 = vsub.f32 %v805_v42, %v898_v26  ;;  %v874_v35 = vmul.f32 %v520_v29, %v520_v29  ;;  %v1574_v19 = vpop.eup %1573  ;;  %v1053_v40 = vsel %vm1051_vm7, %v1052_v16, %v1050_v50  ;;  %v2063_v53 = vmax.f32 %v947_v31, 0.0 }
 0x1b5   : > { %v810_v36 = vpop.f32.mrb[30].mxu1  ;;  %v1055_v43 = vmul.f32 %v1574_v19, %v2032_v32  ;;  %1169 = vst.msk [vmem:[%s1974_s28 + $0x48] sm:$0xff] %vm1159_vm3, %v1053_v40 }
 0x1b6   : > { %v1502_v39 = vpop.f32.mrb[31].mxu1  ;;  %v948_v20 = vmul.f32 0.11111111, %v923_v49  ;;  %v899_v57 = vmul.f32 0.1, %v874_v35  ;;  %1579 = vrsqrt.f32 %v2063_v53  ;;  %vm1077_vm14 = vcmp.eq.f32.partialorder %v2063_v53, inf }
 0x1b7   : > { %v525_v54 = vpop.f32.mrb[32].mxu0  ;;  %v1057_v23 = vsel %vm1056_vm8, %v2032_v32, %v1055_v43  ;;  %v1066_v32 = vand.u32 2147483648, %v2043_v38  ;;  %vm1079_vm15 = vcmp.eq.f32.partialorder %v2063_v53, 0.0 }
 0x1b8   : > { %v875_v47 = vmul.f32 %v525_v54, %v525_v54  ;;  %v1420_v48 = vpop.f32.mrb[33].mxu0  ;;  %v1060_v52 = vsel %vm1058_vm9, %v1059_v44, %v1057_v23  ;;  %v2072_v55 = vmax.f32 %v948_v20, 0.0  ;;  %v924_v24 = vsub.f32 %v810_v36, %v899_v57  ;;  %v1576_v58 = vpop.eup %1575 }
 0x1b9   : > { %v815_v51 = vpop.f32.mrb[32].mxu1  ;;  %1170 = vst.msk [vmem:[%s1974_s28 + $0x50] sm:$0xff] %vm1159_vm3, %v1060_v52  ;;  %v1062_v60 = vmul.f32 %v1576_v58, %v2043_v38 }
 0x1ba   : > { %v1505_v56 = vpop.f32.mrb[33].mxu1  ;;  %v900_v59 = vmul.f32 0.1, %v875_v47  ;;  %1581 = vrsqrt.f32 %v2072_v55  ;;  %v949_v62 = vmul.f32 0.11111111, %v924_v24  ;;  %vm1084_vm0 = vcmp.eq.f32.partialorder %v2072_v55, inf }
 0x1bb   : > { %v530_v27 = vpop.f32.mrb[34].mxu0  ;;  %v1064_v33 = vsel %vm1063_vm10, %v2043_v38, %v1062_v60  ;;  %v1087_v19 = vand.u32 2147483648, %v2072_v55  ;;  %vm1086_vm1 = vcmp.eq.f32.partialorder %v2072_v55, 0.0 }
 0x1bc   : > { %v1423_v61 = vpop.f32.mrb[35].mxu0  ;;  %v925_v28 = vsub.f32 %v815_v51, %v900_v59  ;;  %v876_v63 = vmul.f32 %v530_v27, %v530_v27  ;;  %v1578_v1 = vpop.eup %1577  ;;  %v1067_v3 = vsel %vm1065_vm11, %v1066_v32, %v1064_v33  ;;  %v2083_v34 = vmax.f32 %v949_v62, 0.0 }
 0x1bd   : > { %v820_v0 = vpop.f32.mrb[34].mxu1  ;;  %v1069_v4 = vmul.f32 %v1578_v1, %v2052_v22  ;;  %1171 = vst.msk [vmem:[%s1974_s28 + $0x58] sm:$0xff] %vm1159_vm3, %v1067_v3 }
 0x1be   : > { %v1508_v2 = vpop.f32.mrb[35].mxu1  ;;  %v950_v5 = vmul.f32 0.11111111, %v925_v28  ;;  %v901_v37 = vmul.f32 0.1, %v876_v63  ;;  %1583 = vrsqrt.f32 %v2083_v34  ;;  %vm1091_vm2 = vcmp.eq.f32.partialorder %v2083_v34, inf }
 0x1bf   : > { %v535_v6 = vpop.f32.mrb[36].mxu0  ;;  %v1071_v8 = vsel %vm1070_vm12, %v2052_v22, %v1069_v4  ;;  %v1080_v22 = vand.u32 2147483648, %v2063_v53  ;;  %vm1093_vm4 = vcmp.eq.f32.partialorder %v2083_v34, 0.0 }
 0x1c0   : > { %v877_v10 = vmul.f32 %v535_v6, %v535_v6  ;;  %v1426_v11 = vpop.f32.mrb[37].mxu0  ;;  %v1074_v13 = vsel %vm1072_vm13, %v1073_v7, %v1071_v8  ;;  %v2092_v9 = vmax.f32 %v950_v5, 0.0  ;;  %v926_v14 = vsub.f32 %v820_v0, %v901_v37  ;;  %v1580_v17 = vpop.eup %1579 }
 0x1c1   : > { %v825_v38 = vpop.f32.mrb[36].mxu1  ;;  %1172 = vst.msk [vmem:[%s1974_s28 + $0x60] sm:$0xff] %vm1159_vm3, %v1074_v13  ;;  %v1076_v42 = vmul.f32 %v1580_v17, %v2063_v53 }
 0x1c2   : > { %v1511_v41 = vpop.f32.mrb[37].mxu1  ;;  %v902_v18 = vmul.f32 0.1, %v877_v10  ;;  %1585 = vrsqrt.f32 %v2092_v9  ;;  %v951_v25 = vmul.f32 0.11111111, %v926_v14  ;;  %vm1098_vm5 = vcmp.eq.f32.partialorder %v2092_v9, inf }
 0x1c3   : > { %v540_v12 = vpop.f32.mrb[38].mxu0  ;;  %v1078_v46 = vsel %vm1077_vm14, %v2063_v53, %v1076_v42  ;;  %v1101_v1 = vand.u32 2147483648, %v2092_v9  ;;  %vm1100_vm6 = vcmp.eq.f32.partialorder %v2092_v9, 0.0 }
 0x1c4   : > { %v1429_v21 = vpop.f32.mrb[39].mxu0  ;;  %v927_v45 = vsub.f32 %v825_v38, %v902_v18  ;;  %v878_v15 = vmul.f32 %v540_v12, %v540_v12  ;;  %v1582_v29 = vpop.eup %1581  ;;  %v1081_v16 = vsel %vm1079_vm15, %v1080_v22, %v1078_v46  ;;  %v2103_v49 = vmax.f32 %v951_v25, 0.0 }
 0x1c5   : > { %v830_v26 = vpop.f32.mrb[38].mxu1  ;;  %v1083_v31 = vmul.f32 %v1582_v29, %v2072_v55  ;;  %1173 = vst.msk [vmem:[%s1974_s28 + $0x68] sm:$0xff] %vm1159_vm3, %v1081_v16 }
 0x1c6   : > { %v1514_v30 = vpop.f32.mrb[39].mxu1  ;;  %v952_v35 = vmul.f32 0.11111111, %v927_v45  ;;  %v903_v50 = vmul.f32 0.1, %v878_v15  ;;  %1587 = vrsqrt.f32 %v2103_v49  ;;  %vm1105_vm7 = vcmp.eq.f32.partialorder %v2103_v49, inf }
 0x1c7   : > { %v545_v36 = vpop.f32.mrb[40].mxu0  ;;  %v1085_v43 = vsel %vm1084_vm0, %v2072_v55, %v1083_v31  ;;  %v1094_v55 = vand.u32 2147483648, %v2083_v34  ;;  %vm1107_vm8 = vcmp.eq.f32.partialorder %v2103_v49, 0.0 }
 0x1c8   : > { %v879_v39 = vmul.f32 %v545_v36, %v545_v36  ;;  %v1432_v40 = vpop.f32.mrb[41].mxu0  ;;  %v1088_v20 = vsel %vm1086_vm1, %v1087_v19, %v1085_v43  ;;  %v2112_v54 = vmax.f32 %v952_v35, 0.0  ;;  %v928_v44 = vsub.f32 %v830_v26, %v903_v50  ;;  %v1584_v47 = vpop.eup %1583 }
 0x1c9   : > { %v835_v53 = vpop.f32.mrb[40].mxu1  ;;  %1174 = vst.msk [vmem:[%s1974_s28 + $0x70] sm:$0xff] %vm1159_vm3, %v1088_v20  ;;  %v1090_v51 = vmul.f32 %v1584_v47, %v2083_v34 }
 0x1ca   : > { %v1517_v57 = vpop.f32.mrb[41].mxu1  ;;  %v904_v48 = vmul.f32 0.1, %v879_v39  ;;  %1589 = vrsqrt.f32 %v2112_v54  ;;  %v953_v24 = vmul.f32 0.11111111, %v928_v44  ;;  %vm1112_vm9 = vcmp.eq.f32.partialorder %v2112_v54, inf }
 0x1cb   : > { %v550_v23 = vpop.f32.mrb[42].mxu0  ;;  %v1092_v60 = vsel %vm1091_vm2, %v2083_v34, %v1090_v51  ;;  %v1115_v29 = vand.u32 2147483648, %v2112_v54  ;;  %vm1114_vm10 = vcmp.eq.f32.partialorder %v2112_v54, 0.0 }
 0x1cc   : > { %v1435_v52 = vpop.f32.mrb[43].mxu0  ;;  %v929_v56 = vsub.f32 %v835_v53, %v904_v48  ;;  %v880_v58 = vmul.f32 %v550_v23, %v550_v23  ;;  %v1586_v27 = vpop.eup %1585  ;;  %v1095_v32 = vsel %vm1093_vm4, %v1094_v55, %v1092_v60  ;;  %v2123_v28 = vmax.f32 %v953_v24, 0.0 }
 0x1cd   : > { %v840_v59 = vpop.f32.mrb[42].mxu1  ;;  %v1097_v62 = vmul.f32 %v1586_v27, %v2092_v9  ;;  %1175 = vst.msk [vmem:[%s1974_s28 + $0x78] sm:$0xff] %vm1159_vm3, %v1095_v32 }
 0x1ce   : > { %v1520_v61 = vpop.f32.mrb[43].mxu1  ;;  %v954_v63 = vmul.f32 0.11111111, %v929_v56  ;;  %v905_v33 = vmul.f32 0.1, %v880_v58  ;;  %1591 = vrsqrt.f32 %v2123_v28  ;;  %vm1119_vm11 = vcmp.eq.f32.partialorder %v2123_v28, inf }
 0x1cf   : > { %v555_v0 = vpop.f32.mrb[44].mxu0  ;;  %v1099_v4 = vsel %vm1098_vm5, %v2092_v9, %v1097_v62  ;;  %v1108_v9 = vand.u32 2147483648, %v2103_v49  ;;  %v1122_v53 = vand.u32 2147483648, %v2123_v28  ;;  %vm1121_vm12 = vcmp.eq.f32.partialorder %v2123_v28, 0.0 }
 0x1d0   : > { %v881_v2 = vmul.f32 %v555_v0, %v555_v0  ;;  %v1438_v3 = vpop.f32.mrb[45].mxu0  ;;  %v1102_v5 = vsel %vm1100_vm6, %v1101_v1, %v1099_v4  ;;  %v2132_v6 = vmax.f32 %v954_v63, 0.0  ;;  %v930_v7 = vsub.f32 %v840_v59, %v905_v33  ;;  %v1588_v10 = vpop.eup %1587 }
 0x1d1   : > { %v845_v34 = vpop.f32.mrb[44].mxu1  ;;  %1176 = vst.msk [vmem:[%s1974_s28 + $0x80] sm:$0xff] %vm1159_vm3, %v1102_v5  ;;  %v1104_v38 = vmul.f32 %v1588_v10, %v2103_v49 }
 0x1d2   : > { %v1523_v37 = vpop.f32.mrb[45].mxu1  ;;  %v906_v11 = vmul.f32 0.1, %v881_v2  ;;  %1593 = vrsqrt.f32 %v2132_v6  ;;  %v955_v14 = vmul.f32 0.11111111, %v930_v7  ;;  %vm1126_vm13 = vcmp.eq.f32.partialorder %v2132_v6, inf }
 0x1d3   : > { %v560_v8 = vpop.f32.mrb[46].mxu0  ;;  %v1106_v42 = vsel %vm1105_vm7, %v2103_v49, %v1104_v38  ;;  %v1129_v52 = vand.u32 2147483648, %v2132_v6  ;;  %vm1128_vm14 = vcmp.eq.f32.partialorder %v2132_v6, 0.0 }
 0x1d4   : > { %v1441_v13 = vpop.f32.mrb[47].mxu0  ;;  %v931_v41 = vsub.f32 %v845_v34, %v906_v11  ;;  %v882_v17 = vmul.f32 %v560_v8, %v560_v8  ;;  %v1590_v12 = vpop.eup %1589  ;;  %v1109_v22 = vsel %vm1107_vm8, %v1108_v9, %v1106_v42  ;;  %v980_v45 = vmax.f32 %v955_v14, 0.0 }
 0x1d5   : > { %v850_v18 = vpop.f32.mrb[46].mxu1  ;;  %v1111_v25 = vmul.f32 %v1590_v12, %v2112_v54  ;;  %1177 = vst.msk [vmem:[%s1974_s28 + $0x88] sm:$0xff] %vm1159_vm3, %v1109_v22 }
 0x1d6   : > { %v1526_v21 = vpop.f32.mrb[47].mxu1  ;;  %v956_v15 = vmul.f32 0.11111111, %v931_v41  ;;  %v907_v46 = vmul.f32 0.1, %v882_v17  ;;  %1595 = vrsqrt.f32 %v980_v45  ;;  %vm1133_vm15 = vcmp.eq.f32.partialorder %v980_v45, inf }
 0x1d7   : > { %v565_v26 = vpop.f32.mrb[48].mxu0  ;;  %v1113_v31 = vsel %vm1112_vm9, %v2112_v54, %v1111_v25  ;;  %v1136_v27 = vand.u32 2147483648, %v980_v45  ;;  %vm1135_vm0 = vcmp.eq.f32.partialorder %v980_v45, 0.0 }
 0x1d8   : > { %v883_v30 = vmul.f32 %v565_v26, %v565_v26  ;;  %v1444_v16 = vpop.f32.mrb[49].mxu0  ;;  %v1116_v35 = vsel %vm1114_vm10, %v1115_v29, %v1113_v31  ;;  %v981_v36 = vmax.f32 %v956_v15, 0.0  ;;  %v932_v19 = vsub.f32 %v850_v18, %v907_v46  ;;  %v1592_v39 = vpop.eup %1591 }
 0x1d9   : > { %v855_v49 = vpop.f32.mrb[48].mxu1  ;;  %1178 = vst.msk [vmem:[%s1974_s28 + $0x90] sm:$0xff] %vm1159_vm3, %v1116_v35  ;;  %v1118_v43 = vmul.f32 %v1592_v39, %v2123_v28 }
 0x1da   : > { %v1529_v50 = vpop.f32.mrb[49].mxu1  ;;  %v908_v40 = vmul.f32 0.1, %v883_v30  ;;  %1597 = vrsqrt.f32 %v981_v36  ;;  %v957_v20 = vmul.f32 0.11111111, %v932_v19  ;;  %vm1140_vm1 = vcmp.eq.f32.partialorder %v981_v36, inf }
 0x1db   : > { %v1120_v57 = vsel %vm1119_vm11, %v2123_v28, %v1118_v43  ;;  %v1143_v28 = vand.u32 2147483648, %v981_v36  ;;  %vm1142_vm2 = vcmp.eq.f32.partialorder %v981_v36, 0.0 }
 0x1dc   : > { %v933_v54 = vsub.f32 %v855_v49, %v908_v40  ;;  %v1594_v44 = vpop.eup %1593  ;;  %v1123_v47 = vsel %vm1121_vm12, %v1122_v53, %v1120_v57  ;;  %v982_v23 = vmax.f32 %v957_v20, 0.0 }
 0x1dd   : > { %v1125_v48 = vmul.f32 %v1594_v44, %v2132_v6  ;;  %1179 = vst.msk [vmem:[%s1974_s28 + $0x98] sm:$0xff] %vm1159_vm3, %v1123_v47 }
 0x1de   : > { %v958_v51 = vmul.f32 0.11111111, %v933_v54  ;;  %1599 = vrsqrt.f32 %v982_v23  ;;  %vm1147_vm4 = vcmp.eq.f32.partialorder %v982_v23, inf  ;;  %v1150_v2 = vand.u32 2147483648, %v982_v23 }
 0x1df   : > { %v1127_v55 = vsel %vm1126_vm13, %v2132_v6, %v1125_v48  ;;  %vm1149_vm5 = vcmp.eq.f32.partialorder %v982_v23, 0.0 }
 0x1e0   : > { %v1130_v24 = vsel %vm1128_vm14, %v1129_v52, %v1127_v55  ;;  %v983_v56 = vmax.f32 %v958_v51, 0.0  ;;  %v1596_v58 = vpop.eup %1595 }
 0x1e1   : > { %1180 = vst.msk [vmem:[%s1974_s28 + $0xa0] sm:$0xff] %vm1159_vm3, %v1130_v24  ;;  %v1132_v59 = vmul.f32 %v1596_v58, %v980_v45 }
 0x1e2   : > { %1601 = vrsqrt.f32 %v983_v56  ;;  %vm1154_vm6 = vcmp.eq.f32.partialorder %v983_v56, inf  ;;  %v1157_v6 = vand.u32 2147483648, %v983_v56  ;;  %vm1156_vm7 = vcmp.eq.f32.partialorder %v983_v56, 0.0 }
 0x1e3   : > { %v1134_v61 = vsel %vm1133_vm15, %v980_v45, %v1132_v59 }
 0x1e4   : > { %v1598_v60 = vpop.eup %1597  ;;  %v1137_v32 = vsel %vm1135_vm0, %v1136_v27, %v1134_v61 }
 0x1e5   : > { %v1139_v62 = vmul.f32 %v1598_v60, %v981_v36  ;;  %1181 = vst.msk [vmem:[%s1974_s28 + $0xa8] sm:$0xff] %vm1159_vm3, %v1137_v32 }
 0x1e7   : > { %v1141_v63 = vsel %vm1140_vm1, %v981_v36, %v1139_v62 }
 0x1e8   : > { %v1144_v0 = vsel %vm1142_vm2, %v1143_v28, %v1141_v63  ;;  %v1600_v1 = vpop.eup %1599 }
 0x1e9   : > { %1182 = vst.msk [vmem:[%s1974_s28 + $0xb0] sm:$0xff] %vm1159_vm3, %v1144_v0  ;;  %v1146_v33 = vmul.f32 %v1600_v1, %v982_v23 }
 0x1eb   : > { %v1148_v4 = vsel %vm1147_vm4, %v982_v23, %v1146_v33 }
 0x1ec   : > { %v1602_v3 = vpop.eup %1601  ;;  %v1151_v34 = vsel %vm1149_vm5, %v1150_v2, %v1148_v4 }
 0x1ed   : > { %v1153_v5 = vmul.f32 %v1602_v3, %v983_v56  ;;  %1183 = vst.msk [vmem:[%s1974_s28 + $0xb8] sm:$0xff] %vm1159_vm3, %v1151_v34 }
 0x1ef   : > { %v1155_v7 = vsel %vm1154_vm6, %v983_v56, %v1153_v5 }
 0x1f0   : > { %v1158_v37 = vsel %vm1156_vm7, %v1157_v6, %v1155_v7 }
 0x1f1   : > { %1184 = vst.msk [vmem:[%s1974_s28 + $0xc0] sm:$0xff] %vm1159_vm3, %v1158_v37 }
 0x1f2 PF: > { %s12_s9 = sadd.s32 1, %s1609_s9  }
 0x1f3   : > { %p9_p4 = scmp.ge.s32.totalorder %s12_s9, 4  }
 0x1f5   :  { %11 = sbr.rel (!%p9_p4) target bundleno = 1 (0x1), region = 58 }

</bundles_post_ra>
